<compile_context>
chip_gen: v5e
topology: v5e:2x2
jax: 0.10.0
libtpu: 0.0.40
codegen_flags: <defaults>
</compile_context>

<pallas_src>
import functools

import jax
import jax.numpy as jnp
from jax import lax
from jax.experimental import pallas as pl
from jax.experimental.pallas import tpu as pltpu


# ---------------------------------------------------------------------------
# Pallas kernel
# ---------------------------------------------------------------------------
def conv1d_classifier_kernel(x_ref, w1_ref, s1_ref, t1_ref,
                             w2_ref, s2_ref, t2_ref,
                             wfc_ref, bfc_ref, out_ref,
                             *, batch, compute_dtype, approx_recip, mask_tail):
    x = x_ref[...]                                        # (TB, L*Cin) f32, frame on lanes
    tb = x.shape[0]

    if mask_tail:
        # Zero rows past the true batch so the ragged tail never feeds garbage
        # into exp()/softmax (their output rows are clipped on writeback).
        row = pl.program_id(0) * tb + lax.broadcasted_iota(jnp.int32, (tb, 1), 0)
        x = jnp.where(row < batch, x, 0.0)

    def conv_bn_relu_pool(h, w_ref, s_ref, t_ref):
        # One MXU matmul per layer: the block-Toeplitz weight (built in the
        # wrapper) evaluates Conv1d(k=3, pad=1) for every frame position at
        # once; K,N <= 64 so MXU cost scales only with the TB batch rows.
        y = jnp.dot(h.astype(compute_dtype), w_ref[...],
                    preferred_element_type=jnp.float32)    # (TB, L*Cout) f32
        y = y * s_ref[...] + t_ref[...]                    # conv bias + BN (eval), f32
        y = jnp.maximum(y, 0.0)                            # ReLU
        half = y.shape[-1] // 2                            # even | odd output positions
        return jnp.maximum(y[:, :half], y[:, half:])       # MaxPool1d(2) as a lane max

    h1 = conv_bn_relu_pool(x, w1_ref, s1_ref, t1_ref)      # (TB, L/2 * F1) f32
    h2 = conv_bn_relu_pool(h1, w2_ref, s2_ref, t2_ref)     # (TB, L/4 * F2) f32

    # FC head: h2 lanes are already in the wrapper's (position, channel) weight
    # order -> one matmul, no in-kernel flatten.
    logits = jnp.dot(h2.astype(compute_dtype), wfc_ref[...],
                     preferred_element_type=jnp.float32) + bfc_ref[...]    # (TB, 7)

    # Sigmoid followed by Softmax(dim=1), as in the PyTorch head (f32 math).
    if approx_recip:   # EUP reciprocal (free slot) -- valid for f32 and bf16 paths
        s = pl.reciprocal(1.0 + jnp.exp(-logits), approx=True)
    else:
        s = 1.0 / (1.0 + jnp.exp(-logits))
    m = jnp.max(s, axis=-1, keepdims=True)
    e = jnp.exp(s - m)
    denom = jnp.sum(e, axis=-1, keepdims=True)
    if approx_recip:
        probs = e * pl.reciprocal(denom, approx=True)
    else:
        probs = e / denom
    out_ref[...] = probs.astype(out_ref.dtype)


# ---------------------------------------------------------------------------
# Wrapper (glue)
# ---------------------------------------------------------------------------
def conv1d_classifier(x, kp, *, block_b=2048, use_bf16=True, approx_recip=True):
    """x: (B, frame_length, 5) -> (B, 7) probabilities."""
    B, L, Cin = x.shape
    assert L % 4 == 0, "frame_length must be divisible by 4 (two MaxPool1d(2))"
    assert kp["w1"].shape[0] == L * Cin, "params were built for a different frame_length"

    compute_dtype = jnp.bfloat16 if use_bf16 else jnp.float32

    # The whole frame lives on the lane axis: (B, L, Cin) -> (B, L*Cin) is a
    # free (metadata-only) reshape, and the original f32 activation is read
    # from HBM exactly once by the kernel -- no wrapper pad/cast pass.
    x2 = x.reshape(B, L * Cin)

    cast = lambda a: a.astype(compute_dtype)
    w1, w2, wfc = cast(kp["w1"]), cast(kp["w2"]), cast(kp["wfc"])
    s1, t1, s2, t2, bfc = kp["s1"], kp["t1"], kp["s2"], kp["t2"], kp["bfc"]

    # Batch tile: large enough that the ~0.35us per-grid-step overhead is noise
    # (per-step MXU work ~ 3 * TB/8 pushes), small enough (~TB * 1.5 KiB) to sit
    # far below every chip's VMEM.  Keep >= 2 grid steps when the batch allows
    # so both v7x TensorCores get work; sweep block_b for the target chip.
    TB = min(block_b, B)
    if B >= 16:
        TB = min(TB, pl.cdiv(B, 2))
    if TB < B:
        TB = max(8, (TB // 8) * 8)            # sublane-aligned tile when tiling
    grid = (pl.cdiv(B, TB),)
    mask_tail = (B % TB) != 0

    def param_spec(a):
        zeros = (0,) * a.ndim
        return pl.BlockSpec(tuple(a.shape), lambda i, _z=zeros: _z)

    kernel = functools.partial(conv1d_classifier_kernel,
                               batch=B, compute_dtype=compute_dtype,
                               approx_recip=approx_recip, mask_tail=mask_tail)

    return pl.pallas_call(
        kernel,
        out_shape=jax.ShapeDtypeStruct((B, 7), jnp.float32),
        grid=grid,
        in_specs=[
            pl.BlockSpec((TB, L * Cin), lambda i: (i, 0)),     # activation tile
            param_spec(w1), param_spec(s1), param_spec(t1),    # resident params
            param_spec(w2), param_spec(s2), param_spec(t2),
            param_spec(wfc), param_spec(bfc),
        ],
        out_specs=pl.BlockSpec((TB, 7), lambda i: (i, 0)),
        compiler_params=pltpu.CompilerParams(
            dimension_semantics=("parallel",),
            vmem_limit_bytes=32 * 1024 * 1024),   # explicit, v7x-safe headroom
    )(x2, w1, s1, t1, w2, s2, t2, wfc, bfc)


# ---------------------------------------------------------------------------
# Parameter staging
# ---------------------------------------------------------------------------
def _toeplitz_frame_weight(w_t, frame_len):
    """(Cout, Cin, 3) PyTorch Conv1d weight -> (frame_len*Cin, frame_len*Cout)
    block-banded matmul weight that evaluates Conv1d(k=3, padding=1) for every
    position of the frame in one matmul.  Output columns are parity-major:
        col = parity * (frame_len//2 * Cout) + j * Cout + co,   l_out = 2*j + parity
    so MaxPool1d(2) becomes max(y[:, :half], y[:, half:])."""
    Cout, Cin, K = w_t.shape
    half = (frame_len // 2) * Cout
    wf = jnp.zeros((frame_len * Cin, frame_len * Cout), jnp.float32)
    for parity in range(2):
        for j in range(frame_len // 2):
            l_out = 2 * j + parity
            col0 = parity * half + j * Cout
            for k in range(K):
                l_in = l_out + k - 1                      # padding=1 zero halo
                if 0 <= l_in < frame_len:
                    wf = wf.at[l_in * Cin:(l_in + 1) * Cin,
                               col0:col0 + Cout].set(w_t[:, :, k].T)
    return wf


def init_params(key, filter_size=8, frame_length=8):
    """Deterministic synthetic parameters (PyTorch layouts + kernel-ready layouts)."""
    Cin, K, nclass, eps = 5, 3, 7, 1e-5
    F1, F2 = filter_size, 2 * filter_size
    L, L2, L4 = frame_length, frame_length // 2, frame_length // 4
    ks = jax.random.split(key, 6)

    # PyTorch-layout parameters: Conv1d weight (Cout, Cin, K), Linear weight (out, in).
    w1_t = jax.random.normal(ks[0], (F1, Cin, K), jnp.float32) * 0.2
    b1_t = jax.random.normal(ks[1], (F1,), jnp.float32) * 0.1
    w2_t = jax.random.normal(ks[2], (F2, F1, K), jnp.float32) * 0.2
    b2_t = jax.random.normal(ks[3], (F2,), jnp.float32) * 0.1
    wfc_t = jax.random.normal(ks[4], (nclass, F2 * L4), jnp.float32) * 0.2
    bfc_t = jax.random.normal(ks[5], (nclass,), jnp.float32) * 0.1

    # BatchNorm1d in eval mode with default init (weight=1, bias=0, mean=0, var=1).
    g1, be1, m1, v1 = jnp.ones(F1), jnp.zeros(F1), jnp.zeros(F1), jnp.ones(F1)
    g2, be2, m2, v2 = jnp.ones(F2), jnp.zeros(F2), jnp.zeros(F2), jnp.ones(F2)

    def fold(gamma, beta, mean, var, bias):
        scale = gamma / jnp.sqrt(var + eps)
        shift = (bias - mean) * scale + beta
        return scale, shift

    s1c, t1c = fold(g1, be1, m1, v1, b1_t)
    s2c, t2c = fold(g2, be2, m2, v2, b2_t)

    kernel_params = dict(
        # Frame-matmul conv weights (block-Toeplitz).
        w1=_toeplitz_frame_weight(w1_t, L),                 # (L*Cin,  L*F1)
        s1=jnp.tile(s1c, L)[None, :], t1=jnp.tile(t1c, L)[None, :],
        w2=_toeplitz_frame_weight(w2_t, L2),                # (L2*F1, L2*F2)
        s2=jnp.tile(s2c, L2)[None, :], t2=jnp.tile(t2c, L2)[None, :],
        # torch flatten is channel-major (c, l); kernel lanes are position-major
        # (l, c) -> permute the Linear weight once here.
        wfc=jnp.transpose(wfc_t.reshape(nclass, F2, L4), (2, 1, 0)).reshape(L4 * F2, nclass),
        bfc=bfc_t[None, :],
    )
    torch_params = dict(w1=w1_t, b1=b1_t, g1=g1, be1=be1, m1=m1, v1=v1,
                        w2=w2_t, b2=b2_t, g2=g2, be2=be2, m2=m2, v2=v2,
                        wfc=wfc_t, bfc=bfc_t)
    return kernel_params, torch_params


# Pure-JAX reference mirroring the PyTorch forward (NCL layout), for validation.
def reference(x, p, eps=1e-5):
    h = jnp.transpose(x, (0, 2, 1))                       # input.transpose(1, 2)

    def block(h, w, b, g, be, m, v):
        y = lax.conv_general_dilated(h, w, (1,), [(1, 1)],
                                     dimension_numbers=("NCH", "OIH", "NCH"))
        y = y + b[None, :, None]
        y = (y - m[None, :, None]) / jnp.sqrt(v[None, :, None] + eps) \
            * g[None, :, None] + be[None, :, None]
        y = jnp.maximum(y, 0.0)
        B_, C_, L_ = y.shape
        return jnp.max(y.reshape(B_, C_, L_ // 2, 2), axis=3)

    h = block(h, p["w1"], p["b1"], p["g1"], p["be1"], p["m1"], p["v1"])
    h = block(h, p["w2"], p["b2"], p["g2"], p["be2"], p["m2"], p["v2"])
    flat = h.reshape(h.shape[0], -1)                      # nn.Flatten: (B, C*L)
    logits = flat @ p["wfc"].T + p["bfc"]
    s = jax.nn.sigmoid(logits)
    return jax.nn.softmax(s, axis=1)


if __name__ == "__main__":
    key = jax.random.PRNGKey(0)
    kx, kx2, kp = jax.random.split(key, 3)

    B, frame_length, filter_size, Cin = 2, 8, 8, 5
    # Module forward expects input of shape (B, frame_length, 5).
    x = jax.random.normal(kx, (B, frame_length, Cin), jnp.float32)

    kernel_params, torch_params = init_params(kp, filter_size, frame_length)
    ref = reference(x, torch_params)

    # Exact-semantics check: f32 path + exact division must match the
    # PyTorch-equivalent reference to 1e-5.
    out_f32 = jax.block_until_ready(
        conv1d_classifier(x, kernel_params, use_bf16=False, approx_recip=False))
    assert out_f32.shape == (B, 7), out_f32.shape
    assert jnp.allclose(out_f32, ref, atol=1e-5, rtol=1e-5), (out_f32, ref)

    # bf16 MXU fast path, exercising a multi-step batch grid with a ragged
    # tail (in-kernel masking) and the sublane-aligned tiling branch.
    B2 = 33
    x_big = jax.random.normal(kx2, (B2, frame_length, Cin), jnp.float32)
    ref2 = reference(x_big, torch_params)
    out_bf16 = jax.block_until_ready(
        conv1d_classifier(x_big, kernel_params, use_bf16=True, block_b=8))
    assert out_bf16.shape == (B2, 7), out_bf16.shape
    assert jnp.max(jnp.abs(out_bf16 - ref2)) < 2e-2, (out_bf16, ref2)

    print("KERNEL_OK")
</pallas_src>

<mosaic_0001>
module attributes {stable_mosaic.version = 11 : i64} {
  func.func @conv1d_classifier_kernel(%arg0: i32, %arg1: memref<2x40xf32, #tpu.memory_space<vmem>>, %arg2: memref<40x64xf32, #tpu.memory_space<vmem>>, %arg3: memref<1x64xf32, #tpu.memory_space<vmem>>, %arg4: memref<1x64xf32, #tpu.memory_space<vmem>>, %arg5: memref<32x64xf32, #tpu.memory_space<vmem>>, %arg6: memref<1x64xf32, #tpu.memory_space<vmem>>, %arg7: memref<1x64xf32, #tpu.memory_space<vmem>>, %arg8: memref<32x7xf32, #tpu.memory_space<vmem>>, %arg9: memref<1x7xf32, #tpu.memory_space<vmem>>, %arg10: memref<2x7xf32, #tpu.memory_space<vmem>>) attributes {dimension_semantics = [#tpu.dimension_semantics<parallel>], iteration_bounds = array<i64: 1>, scalar_prefetch = 0 : i64, scratch_operands = 0 : i64, tpu.core_type = #tpu.core_type<tc>, window_params = [{transform_indices = @transform_0, window_bounds = array<i64: 2, 40>}, {pipeline_mode = #tpu.pipeline_mode<synchronous>, transform_indices = @transform_1, window_bounds = array<i64: 40, 64>}, {pipeline_mode = #tpu.pipeline_mode<synchronous>, transform_indices = @transform_2, window_bounds = array<i64: 1, 64>}, {pipeline_mode = #tpu.pipeline_mode<synchronous>, transform_indices = @transform_3, window_bounds = array<i64: 1, 64>}, {pipeline_mode = #tpu.pipeline_mode<synchronous>, transform_indices = @transform_4, window_bounds = array<i64: 32, 64>}, {pipeline_mode = #tpu.pipeline_mode<synchronous>, transform_indices = @transform_5, window_bounds = array<i64: 1, 64>}, {pipeline_mode = #tpu.pipeline_mode<synchronous>, transform_indices = @transform_6, window_bounds = array<i64: 1, 64>}, {pipeline_mode = #tpu.pipeline_mode<synchronous>, transform_indices = @transform_7, window_bounds = array<i64: 32, 7>}, {pipeline_mode = #tpu.pipeline_mode<synchronous>, transform_indices = @transform_8, window_bounds = array<i64: 1, 7>}, {transform_indices = @transform_9, window_bounds = array<i64: 2, 7>}]} {
    %c0 = arith.constant 0 : index
    %c0_0 = arith.constant 0 : index
    %0 = vector.load %arg1[%c0, %c0_0] : memref<2x40xf32, #tpu.memory_space<vmem>>, vector<2x40xf32>
    %c0_1 = arith.constant 0 : index
    %c0_2 = arith.constant 0 : index
    %1 = vector.load %arg2[%c0_1, %c0_2] : memref<40x64xf32, #tpu.memory_space<vmem>>, vector<40x64xf32>
    %cst = arith.constant dense<0.000000e+00> : vector<2x64xf32>
    %2 = tpu.matmul %0, %1, %cst {dimension_numbers = #tpu.dot_dimension_numbers<[1], [0], [0], [1], [0, 0, 1, 1], [], []>} : vector<2x40xf32>, vector<40x64xf32>, vector<2x64xf32> -> vector<2x64xf32>
    %c0_3 = arith.constant 0 : index
    %c0_4 = arith.constant 0 : index
    %3 = vector.load %arg3[%c0_3, %c0_4] : memref<1x64xf32, #tpu.memory_space<vmem>>, vector<1x64xf32>
    %4 = vector.broadcast %3 : vector<1x64xf32> to vector<2x64xf32>
    %5 = arith.mulf %2, %4 : vector<2x64xf32>
    %c0_5 = arith.constant 0 : index
    %c0_6 = arith.constant 0 : index
    %6 = vector.load %arg4[%c0_5, %c0_6] : memref<1x64xf32, #tpu.memory_space<vmem>>, vector<1x64xf32>
    %7 = vector.broadcast %6 : vector<1x64xf32> to vector<2x64xf32>
    %8 = arith.addf %5, %7 : vector<2x64xf32>
    %cst_7 = arith.constant 0.000000e+00 : f32
    %9 = vector.broadcast %cst_7 : f32 to vector<2x64xf32>
    %10 = arith.maximumf %8, %9 : vector<2x64xf32>
    %11 = vector.extract_strided_slice %10 {offsets = [0, 0], sizes = [2, 32], strides = [1, 1]} : vector<2x64xf32> to vector<2x32xf32>
    %12 = vector.extract_strided_slice %10 {offsets = [0, 32], sizes = [2, 32], strides = [1, 1]} : vector<2x64xf32> to vector<2x32xf32>
    %13 = arith.maximumf %11, %12 : vector<2x32xf32>
    %c0_8 = arith.constant 0 : index
    %c0_9 = arith.constant 0 : index
    %14 = vector.load %arg5[%c0_8, %c0_9] : memref<32x64xf32, #tpu.memory_space<vmem>>, vector<32x64xf32>
    %cst_10 = arith.constant dense<0.000000e+00> : vector<2x64xf32>
    %15 = tpu.matmul %13, %14, %cst_10 {dimension_numbers = #tpu.dot_dimension_numbers<[1], [0], [0], [1], [0, 0, 1, 1], [], []>} : vector<2x32xf32>, vector<32x64xf32>, vector<2x64xf32> -> vector<2x64xf32>
    %c0_11 = arith.constant 0 : index
    %c0_12 = arith.constant 0 : index
    %16 = vector.load %arg6[%c0_11, %c0_12] : memref<1x64xf32, #tpu.memory_space<vmem>>, vector<1x64xf32>
    %17 = vector.broadcast %16 : vector<1x64xf32> to vector<2x64xf32>
    %18 = arith.mulf %15, %17 : vector<2x64xf32>
    %c0_13 = arith.constant 0 : index
    %c0_14 = arith.constant 0 : index
    %19 = vector.load %arg7[%c0_13, %c0_14] : memref<1x64xf32, #tpu.memory_space<vmem>>, vector<1x64xf32>
    %20 = vector.broadcast %19 : vector<1x64xf32> to vector<2x64xf32>
    %21 = arith.addf %18, %20 : vector<2x64xf32>
    %cst_15 = arith.constant 0.000000e+00 : f32
    %22 = vector.broadcast %cst_15 : f32 to vector<2x64xf32>
    %23 = arith.maximumf %21, %22 : vector<2x64xf32>
    %24 = vector.extract_strided_slice %23 {offsets = [0, 0], sizes = [2, 32], strides = [1, 1]} : vector<2x64xf32> to vector<2x32xf32>
    %25 = vector.extract_strided_slice %23 {offsets = [0, 32], sizes = [2, 32], strides = [1, 1]} : vector<2x64xf32> to vector<2x32xf32>
    %26 = arith.maximumf %24, %25 : vector<2x32xf32>
    %c0_16 = arith.constant 0 : index
    %c0_17 = arith.constant 0 : index
    %27 = vector.load %arg8[%c0_16, %c0_17] : memref<32x7xf32, #tpu.memory_space<vmem>>, vector<32x7xf32>
    %cst_18 = arith.constant dense<0.000000e+00> : vector<2x7xf32>
    %28 = tpu.matmul %26, %27, %cst_18 {dimension_numbers = #tpu.dot_dimension_numbers<[1], [0], [0], [1], [0, 0, 1, 1], [], []>} : vector<2x32xf32>, vector<32x7xf32>, vector<2x7xf32> -> vector<2x7xf32>
    %c0_19 = arith.constant 0 : index
    %c0_20 = arith.constant 0 : index
    %29 = vector.load %arg9[%c0_19, %c0_20] : memref<1x7xf32, #tpu.memory_space<vmem>>, vector<1x7xf32>
    %30 = vector.broadcast %29 : vector<1x7xf32> to vector<2x7xf32>
    %31 = arith.addf %28, %30 : vector<2x7xf32>
    %cst_21 = arith.constant 0.000000e+00 : f32
    %32 = vector.broadcast %cst_21 : f32 to vector<2x7xf32>
    %33 = arith.subf %32, %31 : vector<2x7xf32>
    %34 = math.exp %33 : vector<2x7xf32>
    %cst_22 = arith.constant 1.000000e+00 : f32
    %35 = vector.broadcast %cst_22 : f32 to vector<2x7xf32>
    %36 = arith.addf %35, %34 : vector<2x7xf32>
    %cst_23 = arith.constant 1.000000e+00 : f32
    %37 = vector.broadcast %cst_23 : f32 to vector<2x7xf32>
    %38 = arith.divf %37, %36 : vector<2x7xf32>
    %cst_24 = arith.constant dense<0xFF800000> : vector<2xf32>
    %39 = vector.multi_reduction <maximumf>, %38, %cst_24 [1] : vector<2x7xf32> to vector<2xf32>
    %40 = vector.shape_cast %39 : vector<2xf32> to vector<2x1xf32>
    %41 = vector.broadcast %40 : vector<2x1xf32> to vector<2x7xf32>
    %42 = arith.subf %38, %41 : vector<2x7xf32>
    %43 = math.exp %42 : vector<2x7xf32>
    %cst_25 = arith.constant dense<0.000000e+00> : vector<2xf32>
    %44 = vector.multi_reduction <add>, %43, %cst_25 [1] : vector<2x7xf32> to vector<2xf32>
    %45 = vector.shape_cast %44 : vector<2xf32> to vector<2x1xf32>
    %46 = vector.broadcast %45 : vector<2x1xf32> to vector<2x7xf32>
    %47 = arith.divf %43, %46 : vector<2x7xf32>
    %c0_26 = arith.constant 0 : index
    %c0_27 = arith.constant 0 : index
    %48 = vector.load %arg10[%c0_26, %c0_27] : memref<2x7xf32, #tpu.memory_space<vmem>>, vector<2x7xf32>
    tpu.vector_store %arg10[%c0_26, %c0_27], %47 {strides = array<i32>} : memref<2x7xf32, #tpu.memory_space<vmem>>, vector<2x7xf32>,
    return
  }
  func.func @transform_0(%arg0: i32) -> (i32, i32) {
    %c0_i32 = arith.constant 0 : i32
    %c0_i32_0 = arith.constant 0 : i32
    return %arg0, %c0_i32 : i32, i32
  }
  func.func @transform_1(%arg0: i32) -> (i32, i32) {
    %c0_i32 = arith.constant 0 : i32
    %c0_i32_0 = arith.constant 0 : i32
    %c0_i32_1 = arith.constant 0 : i32
    return %c0_i32, %c0_i32_0 : i32, i32
  }
  func.func @transform_2(%arg0: i32) -> (i32, i32) {
    %c0_i32 = arith.constant 0 : i32
    %c0_i32_0 = arith.constant 0 : i32
    %c0_i32_1 = arith.constant 0 : i32
    return %c0_i32, %c0_i32_0 : i32, i32
  }
  func.func @transform_3(%arg0: i32) -> (i32, i32) {
    %c0_i32 = arith.constant 0 : i32
    %c0_i32_0 = arith.constant 0 : i32
    %c0_i32_1 = arith.constant 0 : i32
    return %c0_i32, %c0_i32_0 : i32, i32
  }
  func.func @transform_4(%arg0: i32) -> (i32, i32) {
    %c0_i32 = arith.constant 0 : i32
    %c0_i32_0 = arith.constant 0 : i32
    %c0_i32_1 = arith.constant 0 : i32
    return %c0_i32, %c0_i32_0 : i32, i32
  }
  func.func @transform_5(%arg0: i32) -> (i32, i32) {
    %c0_i32 = arith.constant 0 : i32
    %c0_i32_0 = arith.constant 0 : i32
    %c0_i32_1 = arith.constant 0 : i32
    return %c0_i32, %c0_i32_0 : i32, i32
  }
  func.func @transform_6(%arg0: i32) -> (i32, i32) {
    %c0_i32 = arith.constant 0 : i32
    %c0_i32_0 = arith.constant 0 : i32
    %c0_i32_1 = arith.constant 0 : i32
    return %c0_i32, %c0_i32_0 : i32, i32
  }
  func.func @transform_7(%arg0: i32) -> (i32, i32) {
    %c0_i32 = arith.constant 0 : i32
    %c0_i32_0 = arith.constant 0 : i32
    %c0_i32_1 = arith.constant 0 : i32
    return %c0_i32, %c0_i32_0 : i32, i32
  }
  func.func @transform_8(%arg0: i32) -> (i32, i32) {
    %c0_i32 = arith.constant 0 : i32
    %c0_i32_0 = arith.constant 0 : i32
    %c0_i32_1 = arith.constant 0 : i32
    return %c0_i32, %c0_i32_0 : i32, i32
  }
  func.func @transform_9(%arg0: i32) -> (i32, i32) {
    %c0_i32 = arith.constant 0 : i32
    %c0_i32_0 = arith.constant 0 : i32
    return %arg0, %c0_i32 : i32, i32
  }
}

</mosaic_0001>

<bundles_post_ra>
// kernel: tpu_custom_call.1
= control target key start
LH: loop header
LB: loop body
LE: loop exit
PB: predicated region body
PF: predicated region fallthrough
CT: control target
= control target key end

     0   :  { %14 = vsyncpa [#allocation3], 0  ;;  %s459_s0 = inlined_call_operand.hbm [shape: f32[2,40], index: 0, kind: input, shape index: {}]   ;;  %s460_s1 = inlined_call_operand.vmem [shape: f32[40,64], index: 1, kind: input, shape index: {}]   ;;  %s461_s2 = inlined_call_operand.vmem [shape: f32[1,64], index: 2, kind: input, shape index: {}]   ;;  %s462_s3 = inlined_call_operand.vmem [shape: f32[1,64], index: 3, kind: input, shape index: {}]   ;;  %s463_s4 = inlined_call_operand.hbm [shape: f32[32,64], index: 4, kind: input, shape index: {}]   ;;  %s464_s5 = inlined_call_operand.vmem [shape: f32[1,64], index: 5, kind: input, shape index: {}]   ;;  %s465_s6 = inlined_call_operand.vmem [shape: f32[1,64], index: 6, kind: input, shape index: {}]   ;;  %s466_s7 = inlined_call_operand.vmem [shape: f32[32,7], index: 7, kind: input, shape index: {}]   ;;  %s467_s8 = inlined_call_operand.vmem [shape: f32[1,7], index: 8, kind: input, shape index: {}]   ;;  %s468_s9 = inlined_call_operand.hbm [shape: f32[2,7], index: 9, kind: output, shape index: {}]  }
   0x1   :  { %15 = vsyncpa [#allocation6], 0 }
   0x2   :  { %16 = vsyncpa [#allocation4], 0  ;;  %s22_s11 = sshll.u32 %s459_s0, 4  ;;  %s347_s12 = smov [#allocation2]   ;;  %s23_s11 = int_to_ptr.hbm [resolvable:$true] %s22_s11 }
   0x3   :  { %s24_s13 = sshll.u32 %s347_s12, 4  ;;  %s38_s16 = sshll.u32 %s463_s4, 4  ;;  %s25_s13 = int_to_ptr.vmem [resolvable:$true] %s24_s13  ;;  %s39_s16 = int_to_ptr.hbm [resolvable:$true] %s38_s16 }
   0x4   :  { %27 = dma.hbm_to_vmem [thread:$0]  %s23_s11, 32, %s25_s13, [#allocation3]  }
   0x5   :  { %s348_s17 = smov [#allocation5]   ;;  %s349_s19 = smov 128  }
   0x6   :  { %s40_s18 = sshll.u32 %s348_s17, 4  ;;  %s350_s20 = smov 8   ;;  %s41_s18 = int_to_ptr.vmem [resolvable:$true] %s40_s18 }
   0x7   :  { %46 = dma.hbm_to_vmem [thread:$0]  %s39_s16, 512, %s41_s18, [#allocation6], %s349_s19, %s349_s19, %s350_s20  }
   0x8   :  { %341 = dma.done.wait [#allocation3], 32  }
   0x9   :  { %342 = vsyncadd [#allocation3], 4294967264 }
   0xa   :  { %343 = dma.done.wait [#allocation6], 512  }
   0xb   :  { %344 = vsyncadd [#allocation6], 4294966784  ;;  %v68_v0 = vld [vmem:[%s460_s1 + $0x20] sm:$0xff]  ;;  %v67_v1 = vld [vmem:[%s460_s1 + $0x18] sm:$0xff]  ;;  %vm69_vm0 = vcmask 326656   ;;  %vm113_vm1 = vcmask 261120  }
   0xc   :  { %84 = vmatpush.msra.mxu0 %v68_v0  ;;  %v66_v2 = vld [vmem:[%s460_s1 + $0x10] sm:$0xff]  ;;  %v65_v3 = vld [vmem:[%s460_s1 + $0x8] sm:$0xff]  ;;  %v64_v4 = vld [vmem:[%s460_s1] sm:$0xff]  ;;  %s351_s1 = smov 96   ;;  %vm203_vm5 = vcmask 50176   ;;  %s236_s23 = sshll.u32 %s468_s9, 4  ;;  %s237_s23 = int_to_ptr.hbm [resolvable:$true] %s236_s23 }
   0xd   :  { %v63_v5 = vld [vmem:[#allocation2] sm:$0x3]  ;;  %v111_v7 = vld [vmem:[#allocation5 + $0x10] sm:$0xff]  ;;  %v110_v8 = vld [vmem:[#allocation5 + $0x8] sm:$0xff] }
   0xe   :  { %85 = vmatpush.msra.mxu0 %v67_v1  ;;  %v112_v6 = vld [vmem:[#allocation5 + $0x18] sm:$0xff]  ;;  %v109_v15 = vld [vmem:[#allocation5] sm:$0xff]  ;;  %v155_v19 = vld [vmem:[%s466_s7 + $0x10] sm:$0xff] }
   0xf   :  { %129 = vmatpush.msra.mxu1 %v112_v6  ;;  %v256_v9 = vld [vmem:[%s461_s2] ss:$0 sm:$0xff]  ;;  %v156_v18 = vld [vmem:[%s466_s7 + $0x18] sm:$0xff]  ;;  %v154_v20 = vld [vmem:[%s466_s7 + $0x8] sm:$0xff] }
  0x10   :  { %86 = vmatpush.msra.mxu0 %v66_v2  ;;  %v257_v10 = vld [vmem:[%s462_s3] ss:$0 sm:$0xff]  ;;  %176 = vmatpush.msra.mxu2 %v156_v18 }
  0x11   :  { %130 = vmatpush.msra.mxu1 %v111_v7  ;;  %v258_v21 = vld [vmem:[%s464_s5] ss:$0 sm:$0xff] }
  0x12   :  { %87 = vmatpush.msra.mxu0 %v65_v3  ;;  %177 = vmatpush.msra.mxu2 %v155_v19  ;;  %v259_v22 = vld [vmem:[%s465_s6] ss:$0 sm:$0xff]  ;;  %s352_s6 = smov [#allocation7]  }
  0x13   :  { %131 = vmatpush.msra.mxu1 %v110_v8  ;;  %v153_v27 = vld [vmem:[%s466_s7] sm:$0xff]  ;;  %s234_s7 = sshll.u32 %s352_s6, 4  ;;  %s235_s7 = int_to_ptr.vmem [resolvable:$true] %s234_s7 }
  0x14   :  { %88 = vmatpush.msra.mxu0 %v64_v4  ;;  %178 = vmatpush.msra.mxu2 %v154_v20  ;;  %v260_v30 = vld [vmem:[%s467_s8] ss:$0 sm:$0xff] }
  0x15   :  { %247 = vmatmul.msk.f32.vlgmr.msra.gmra.mxu0 %vm69_vm0, %v63_v5  ;;  %132 = vmatpush.msra.mxu1 %v109_v15 }
  0x16   :  { %179 = vmatpush.msra.mxu2 %v153_v27 }
  0x92   :  { %v90_v11 = vpop.f32.mrf.mxu0 }
  0x93   :  { %v97_v12 = vmul.f32 %v256_v9, %v90_v11 }
  0x95   :  { %v102_v13 = vadd.f32 %v257_v10, %v97_v12 }
  0x97   :  { %v103_v14 = vmax.f32 %v102_v13, 0.0 }
  0x99   :  { %105 = vrot.lane.b32.xlu0 %v103_v14, %s351_s1 }
 0x10b   :  { %v106_v16 = vpop.permute.xlu0 %105 }
 0x10c   :  { %v108_v17 = vmax.f32 %v103_v14, %v106_v16 }
 0x10e   :  { %248 = vmatmul.msk.f32.vlgmr.msra.gmra.mxu1 %vm113_vm1, %v108_v17 }
 0x18b   :  { %v134_v23 = vpop.f32.mrf.mxu1 }
 0x18c   :  { %v141_v24 = vmul.f32 %v258_v21, %v134_v23 }
 0x18e   :  { %v146_v25 = vadd.f32 %v259_v22, %v141_v24 }
 0x190   :  { %v147_v26 = vmax.f32 %v146_v25, 0.0 }
 0x192   :  { %149 = vrot.lane.b32.xlu0 %v147_v26, %s351_s1 }
 0x204   :  { %v150_v28 = vpop.permute.xlu0 %149 }
 0x205   :  { %v152_v29 = vmax.f32 %v147_v26, %v150_v28 }
 0x207   :  { %249 = vmatmul.msk.f32.vlgmr.msra.gmra.mxu2 %vm113_vm1, %v152_v29 }
 0x28a   :  { %v181_v31 = vpop.f32.mrf.mxu2 }
 0x28b   :  { %v182_v32 = vadd.f32 %v260_v30, %v181_v31 }
 0x28d   :  { %v184_v33 = vsub.f32 0.0, %v182_v32 }
 0x28f   :  { %v185_v34 = vmul.f32 1.442695, %v184_v33 }
 0x291   :  { %261 = vpow2.f32 %v185_v34 }
 0x297   :  { %v262_v35 = vpop.eup %261 }
 0x298   :  { %v187_v36 = vadd.f32 1.0, %v262_v35 }
 0x29a   :  { %263 = vrcp.f32 %v187_v36  ;;  %v199_v40 = vand.u32 2147483648, %v187_v36  ;;  %v197_v42 = vand.u32 2147483647, %v187_v36  ;;  %vm193_vm3 = vweird.f32 %v187_v36 }
 0x29c   :  { %v200_v44 = vor.u32 1.1754944e-38, %v199_v40  ;;  %vm198_vm6 = vcmp.eq.f32.partialorder %v197_v42, 8.507059e+37 }
 0x2a0   :  { %v264_v37 = vpop.eup %263 }
 0x2a1   :  { %v189_v38 = vmul.f32 %v264_v37, %v187_v36  ;;  %vm194_vm2 = vweird.f32 %v264_v37 }
 0x2a2   :  { %vm195_vm4 = vmor %vm193_vm3, %vm194_vm2 }
 0x2a3   :  { %v190_v39 = vsub.f32 1.0, %v189_v38 }
 0x2a5   :  { %v191_v41 = vmul.f32 %v264_v37, %v190_v39 }
 0x2a7   :  { %v192_v43 = vadd.f32 %v264_v37, %v191_v41 }
 0x2a9   :  { %v196_v45 = vsel %vm195_vm4, %v264_v37, %v192_v43 }
 0x2aa   :  { %v201_v46 = vsel %vm198_vm6, %v200_v44, %v196_v45 }
 0x2ab   :  { %v204_v47 = vsel %vm203_vm5, %v201_v46, -inf }
 0x2ac   :  { %205 = vmax.xlane.f32.xlu1 %v204_v47 }
 0x31f   :  { %v206_v48 = vpop.xlane.xlu1 %205 }
 0x320   :  { %v207_v49 = vsub.f32 %v201_v46, %v206_v48 }
 0x322   :  { %v208_v50 = vmul.f32 1.442695, %v207_v49 }
 0x324   :  { %265 = vpow2.f32 %v208_v50 }
 0x32a   :  { %v266_v51 = vpop.eup %265 }
 0x32b   :  { %v210_v52 = vsel %vm203_vm5, %v266_v51, 0.0 }
 0x32c   :  { %211 = vadd.xlane.f32.xlu1 %v210_v52 }
 0x39f   :  { %v212_v53 = vpop.xlane.xlu1 %211 }
 0x3a0   :  { %267 = vrcp.f32 %v212_v53  ;;  %v224_v57 = vand.u32 2147483648, %v212_v53  ;;  %v222_v59 = vand.u32 2147483647, %v212_v53  ;;  %vm218_vm8 = vweird.f32 %v212_v53 }
 0x3a2   :  { %v225_v61 = vor.u32 1.1754944e-38, %v224_v57  ;;  %vm223_vm10 = vcmp.eq.f32.partialorder %v222_v59, 8.507059e+37 }
 0x3a6   :  { %v268_v54 = vpop.eup %267 }
 0x3a7   :  { %v214_v55 = vmul.f32 %v268_v54, %v212_v53  ;;  %vm219_vm7 = vweird.f32 %v268_v54 }
 0x3a8   :  { %vm220_vm9 = vmor %vm218_vm8, %vm219_vm7 }
 0x3a9   :  { %v215_v56 = vsub.f32 1.0, %v214_v55 }
 0x3ab   :  { %v216_v58 = vmul.f32 %v268_v54, %v215_v56 }
 0x3ad   :  { %v217_v60 = vadd.f32 %v268_v54, %v216_v58 }
 0x3af   :  { %v221_v62 = vsel %vm220_vm9, %v268_v54, %v217_v60 }
 0x3b0   :  { %v226_v63 = vsel %vm223_vm10, %v225_v61, %v221_v62 }
 0x3b1   :  { %v227_v0 = vmul.f32 %v266_v51, %v226_v63 }
 0x3b3   :  { %228 = vst.msk [vmem:[#allocation7] sm:$0x3] %vm203_vm5, %v227_v0 }
 0x3b4   :  { %239 = dma.vmem_to_hbm [thread:$0]  %s235_s7, 32, %s237_s23, [#allocation4]  }
 0x3b5   :  { %345 = dma.done.wait [#allocation4], 32  }
 0x3b6   :  { %346 = vsyncadd [#allocation4], 4294967264 }
 0x3b7   :  { %244 = vsyncpa [#allocation3], 1 }
 0x3b8   :  { %245 = vsyncpa [#allocation6], 1 }
 0x3b9   :  { %246 = vsyncpa [#allocation4], 1 }

</bundles_post_ra>
